<compile_context>
chip_gen: v6e
topology: v6e:2x2x1
jax: 0.10.0
libtpu: 0.0.40
codegen_flags: <defaults>
</compile_context>

<pallas_src>
import jax
import jax.numpy as jnp
from jax.experimental import pallas as pl
from jax.experimental.pallas import tpu as pltpu


# ---- packed (24, 128) parameter-slab layout ---------------------------------
#   rows  0..11, lanes  0..15 : w1_big  (12, 16)  block-diagonal conv1 weight
#   rows  0..15, lanes 16..23 : w2_2d   (16,  8)  conv2 weight, row = tap*4+ci
#   row  16,     lanes  0..15 : b1 tiled (1, 16)  conv1 bias per output column
#   row  16,     lanes 16..23 : b2       (1,  8)  conv2 bias
#   row  16,     lanes 24..31 : wf       (1,  8)  fc weight (row vector)
#   row  16,     lane  32     : bf       (1,  1)  fc bias
_SLAB_ROWS = 24
_SLAB_COLS = 128
_BIAS_ROW = 16


def cnn_kernel(x_ref, p_ref, o_ref):
    # Static ref views into the packed VMEM slab (zero-cost slicing).
    x = x_ref[...]                                      # (1, 12)
    w1 = p_ref[0:12, 0:16]                              # (12, 16)
    w2 = p_ref[0:16, 16:24]                              # (16, 8)
    b1 = p_ref[_BIAS_ROW:_BIAS_ROW + 1, 0:16]            # (1, 16)
    b2 = p_ref[_BIAS_ROW:_BIAS_ROW + 1, 16:24]           # (1, 8)
    wf = p_ref[_BIAS_ROW:_BIAS_ROW + 1, 24:32]           # (1, 8)
    bf = p_ref[_BIAS_ROW:_BIAS_ROW + 1, 32:33]           # (1, 1)

    # conv1 (k=3, s=3) as one dot against the pre-built block-diagonal weight.
    # Output column t*4 + ci == activation at position t, channel ci.
    h1 = jnp.maximum(
        jnp.dot(x, w1, preferred_element_type=jnp.float32) + b1, 0.0)   # (1, 16)
    # dropout -> identity (eval mode)

    # conv2 (k=4, s=1) -> single output position; all 4 taps in one matmul.
    h2 = jnp.maximum(
        jnp.dot(h1, w2, preferred_element_type=jnp.float32) + b2, 0.0)  # (1, 8)
    # dropout -> identity (eval mode)

    # fc: Linear(8, 1) fused as VPU multiply + lane reduce (no third MXU dot).
    o_ref[...] = jnp.sum(h2 * wf, axis=-1, keepdims=True) + bf          # (1, 1)


def pack_params(w1, b1, w2, b2, wf, bf):
    """Build the (24, 128) f32 weight slab ONCE (outside the per-call path)."""
    # Hard-wired to the shapes the module's fc=Linear(8,1) forces: fail loudly.
    assert w1.shape == (4, 1, 3), w1.shape   # Conv1d(1, 4, kernel=3, stride=3)
    assert b1.shape == (4,), b1.shape
    assert w2.shape == (8, 4, 4), w2.shape   # Conv1d(4, 8, kernel=4, stride=1)
    assert b2.shape == (8,), b2.shape
    assert wf.shape == (1, 8), wf.shape      # Linear(8, 1)
    assert bf.shape == (1,), bf.shape

    # conv1 weight (co=4, ci=1, k=3) -> (k=3, co=4), then block-diagonal
    # (12, 16): rows 3t:3t+3, cols 4t:4t+4 hold the same (3, 4) weight per
    # output position t (im2col folded into the weight).
    w1m = jnp.transpose(w1[:, 0, :], (1, 0)).astype(jnp.float32)   # (3, 4)
    w1_big = jnp.zeros((12, 16), jnp.float32)
    for t in range(4):
        w1_big = w1_big.at[3 * t:3 * t + 3, 4 * t:4 * t + 4].set(w1m)
    b1_big = jnp.tile(b1.reshape(1, 4).astype(jnp.float32), (1, 4))  # (1, 16)

    # conv2 weight (co=8, ci=4, tap=4) -> (tap, ci, co) -> (16, 8); row index
    # tap*4 + ci matches the conv1 output column layout above.
    w2_2d = jnp.transpose(w2, (2, 1, 0)).reshape(16, 8).astype(jnp.float32)

    slab = jnp.zeros((_SLAB_ROWS, _SLAB_COLS), jnp.float32)
    slab = slab.at[0:12, 0:16].set(w1_big)
    slab = slab.at[0:16, 16:24].set(w2_2d)
    slab = slab.at[_BIAS_ROW, 0:16].set(b1_big[0])
    slab = slab.at[_BIAS_ROW, 16:24].set(b2.astype(jnp.float32))
    slab = slab.at[_BIAS_ROW, 24:32].set(wf.reshape(8).astype(jnp.float32))
    slab = slab.at[_BIAS_ROW, 32].set(bf.astype(jnp.float32)[0])
    return slab


@jax.jit
def cnn_forward(x, slab):
    """x: (1, 1, 12); slab: pre-packed params from pack_params(). Returns (1,)."""
    x2 = x.reshape(1, 12).astype(jnp.float32)
    out = pl.pallas_call(
        cnn_kernel,
        out_shape=jax.ShapeDtypeStruct((1, 1), jnp.float32),
        in_specs=[
            pl.BlockSpec(memory_space=pltpu.MemorySpace.VMEM),   # x (1, 12)
            pl.BlockSpec(memory_space=pltpu.MemorySpace.VMEM),   # slab (24, 128)
        ],
        out_specs=pl.BlockSpec(memory_space=pltpu.MemorySpace.VMEM),
        cost_estimate=pl.CostEstimate(
            flops=704,            # 2*(1*12*16) + 2*(1*16*8) + relu/fc epsilon
            transcendentals=0,
            bytes_accessed=_SLAB_ROWS * _SLAB_COLS * 4 + 12 * 4 + 4,
        ),
    )(x2, slab)
    return out.reshape(1)
    # TODO(synk): single-sample inference is dominated by the fixed pallas_call
    # dispatch + DMA setup (~1-2 us) vs ~700 FLOPs of math; if throughput ever
    # matters, add a batch grid axis marked "parallel" (megacore split on v7x),
    # keep the slab's index_map constant (weight resident), and emit the batched
    # output lane-dense (batch as last dim in multiples of 128).


def ref_forward(x, w1, b1, w2, b2, wf, bf):
    """Pure-JAX reference mirroring the PyTorch forward (dropout in eval)."""
    xv = x[0, 0]                                                   # (12,)
    h1 = jnp.stack(
        [jnp.sum(w1[:, 0, :] * jax.lax.dynamic_slice(xv, (3 * t,), (3,)), axis=1)
         for t in range(4)], axis=1) + b1[:, None]                 # (4 ch, 4 pos)
    h1 = jnp.maximum(h1, 0.0)
    h2 = jnp.einsum('cik,ik->c', w2, h1) + b2                      # (8,)
    h2 = jnp.maximum(h2, 0.0)
    return wf @ h2 + bf                                            # (1,)


if __name__ == "__main__":
    key = jax.random.PRNGKey(0)
    k1, k2, k3, k4, k5, k6, kx = jax.random.split(key, 7)

    # Deterministic synthetic parameters (shapes from the module's __init__).
    w1 = jax.random.normal(k1, (4, 1, 3), jnp.float32) * 0.5   # Conv1d(1, 4, 3, 3)
    b1 = jax.random.normal(k2, (4,), jnp.float32) * 0.1
    w2 = jax.random.normal(k3, (8, 4, 4), jnp.float32) * 0.25  # Conv1d(4, 8, 4, 1)
    b2 = jax.random.normal(k4, (8,), jnp.float32) * 0.1
    wf = jax.random.normal(k5, (1, 8), jnp.float32) * 0.3      # Linear(8, 1)
    bf = jax.random.normal(k6, (1,), jnp.float32) * 0.1

    x = jax.random.normal(kx, (1, 1, 12), jnp.float32)         # (N=1, C_in=1, L=12)

    # Setup-time packing (once); only x travels through the jitted forward.
    slab = jax.block_until_ready(pack_params(w1, b1, w2, b2, wf, bf))

    out = jax.block_until_ready(cnn_forward(x, slab))
    ref = jax.block_until_ready(ref_forward(x, w1, b1, w2, b2, wf, bf))

    assert out.shape == (1,)
    assert jnp.allclose(out, ref, atol=1e-5, rtol=1e-5), (out, ref)
    print("KERNEL_OK")
</pallas_src>

<mosaic_0001>
module attributes {stable_mosaic.version = 11 : i64} {
  func.func @cnn_kernel(%arg0: memref<1x12xf32, #tpu.memory_space<vmem>>, %arg1: memref<24x128xf32, #tpu.memory_space<vmem>>, %arg2: memref<1x1xf32, #tpu.memory_space<vmem>>) attributes {dimension_semantics = [], scalar_prefetch = 0 : i64, scratch_operands = 0 : i64, tpu.core_type = #tpu.core_type<tc>} {
    %c0 = arith.constant 0 : index
    %c0_0 = arith.constant 0 : index
    %0 = vector.load %arg0[%c0, %c0_0] : memref<1x12xf32, #tpu.memory_space<vmem>>, vector<1x12xf32>
    %c0_1 = arith.constant 0 : index
    %c0_2 = arith.constant 0 : index
    %1 = vector.load %arg1[%c0_1, %c0_2] : memref<24x128xf32, #tpu.memory_space<vmem>>, vector<12x16xf32>
    %c0_3 = arith.constant 0 : index
    %c16 = arith.constant 16 : index
    %2 = vector.load %arg1[%c0_3, %c16] : memref<24x128xf32, #tpu.memory_space<vmem>>, vector<16x8xf32>
    %c16_4 = arith.constant 16 : index
    %c0_5 = arith.constant 0 : index
    %3 = vector.load %arg1[%c16_4, %c0_5] : memref<24x128xf32, #tpu.memory_space<vmem>>, vector<1x16xf32>
    %c16_6 = arith.constant 16 : index
    %c16_7 = arith.constant 16 : index
    %4 = vector.load %arg1[%c16_6, %c16_7] : memref<24x128xf32, #tpu.memory_space<vmem>>, vector<1x8xf32>
    %c16_8 = arith.constant 16 : index
    %c24 = arith.constant 24 : index
    %5 = vector.load %arg1[%c16_8, %c24] : memref<24x128xf32, #tpu.memory_space<vmem>>, vector<1x8xf32>
    %c16_9 = arith.constant 16 : index
    %c32 = arith.constant 32 : index
    %6 = vector.load %arg1[%c16_9, %c32] : memref<24x128xf32, #tpu.memory_space<vmem>>, vector<1x1xf32>
    %cst = arith.constant dense<0.000000e+00> : vector<1x16xf32>
    %7 = tpu.matmul %0, %1, %cst {dimension_numbers = #tpu.dot_dimension_numbers<[1], [0], [0], [1], [0, 0, 1, 1], [], []>} : vector<1x12xf32>, vector<12x16xf32>, vector<1x16xf32> -> vector<1x16xf32>
    %8 = arith.addf %7, %3 : vector<1x16xf32>
    %cst_10 = arith.constant 0.000000e+00 : f32
    %9 = vector.broadcast %cst_10 : f32 to vector<1x16xf32>
    %10 = arith.maximumf %8, %9 : vector<1x16xf32>
    %cst_11 = arith.constant dense<0.000000e+00> : vector<1x8xf32>
    %11 = tpu.matmul %10, %2, %cst_11 {dimension_numbers = #tpu.dot_dimension_numbers<[1], [0], [0], [1], [0, 0, 1, 1], [], []>} : vector<1x16xf32>, vector<16x8xf32>, vector<1x8xf32> -> vector<1x8xf32>
    %12 = arith.addf %11, %4 : vector<1x8xf32>
    %cst_12 = arith.constant 0.000000e+00 : f32
    %13 = vector.broadcast %cst_12 : f32 to vector<1x8xf32>
    %14 = arith.maximumf %12, %13 : vector<1x8xf32>
    %15 = arith.mulf %14, %5 : vector<1x8xf32>
    %cst_13 = arith.constant dense<0.000000e+00> : vector<1xf32>
    %16 = vector.multi_reduction <add>, %15, %cst_13 [1] : vector<1x8xf32> to vector<1xf32>
    %17 = vector.shape_cast %16 : vector<1xf32> to vector<1x1xf32>
    %18 = arith.addf %17, %6 : vector<1x1xf32>
    %c0_14 = arith.constant 0 : index
    %c0_15 = arith.constant 0 : index
    %19 = vector.load %arg2[%c0_14, %c0_15] : memref<1x1xf32, #tpu.memory_space<vmem>>, vector<1x1xf32>
    tpu.vector_store %arg2[%c0_14, %c0_15], %18 {strides = array<i32>} : memref<1x1xf32, #tpu.memory_space<vmem>>, vector<1x1xf32>,
    return
  }
}

</mosaic_0001>

<bundles_post_ra>
// kernel: cnn_forward.1
= control target key start
LH: loop header
LB: loop body
LE: loop exit
PB: predicated region body
PF: predicated region fallthrough
CT: control target
= control target key end

     0   :  { %7 = vsyncpa [#allocation3], 0  ;;  %s336_s0 = inlined_call_operand.vmem [shape: f32[1,12], index: 0, kind: input, shape index: {}]   ;;  %s337_s1 = inlined_call_operand.hbm [shape: f32[24,128], index: 1, kind: input, shape index: {}]   ;;  %s338_s2 = inlined_call_operand.hbm [shape: f32[1,1], index: 2, kind: output, shape index: {}]  }
   0x1   :  { %8 = vsyncpa [#allocation4], 0  ;;  %s303_s9 = smov [#allocation2]  }
   0x2   :  { %s16_s10 = sshll.u32 %s303_s9, 4  ;;  %s17_s10 = int_to_ptr.vmem [resolvable:$true] %s16_s10 }
   0x3   :  { %s267_s11 = scalar_lea.vmem %s17_s10, 384  ;;  %p272_p1 = scmp.lt.s32.totalorder %s17_s10, %s17_s10 }
   0x4   :  { %p268_p0 = scmp.ne.s32.totalorder %s17_s10, %s267_s11  ;;  %p273_p2 = scmp.lt.s32.totalorder %s267_s11, %s267_s11 }
   0x6   :  { %p274_p3 = por %p273_p2, %p272_p1 }
   0x8   :  { %p275_p4 = pnand %p274_p3, %p268_p0 }
   0xa   :  { %278 = shalt.err (!%p275_p4)
}
   0xb   :  { %s304_s12 = smov 128   ;;  %s305_s13 = smov 8  }
   0xc   :  { %22 = dma.hbm_to_vmem [thread:$0]  %s337_s1, 384, %s17_s10, [#allocation3], %s304_s12, %s304_s12, %s305_s13  }
   0xd   :  { %299 = dma.done.wait [#allocation3], 384  }
   0xe   :  { %300 = vsyncadd [#allocation3], 4294966912  ;;  %v306_v0 = vmov 0.0   ;;  %vm307_vm0 = vmmov 0   ;;  %vm35_vm1 = vcmask 1043456   ;;  %v27_v2 = vld [vmem:[#allocation2] sm:$0xff] }
   0xf   :  { %236 = vmatprep.subr.mxu0 %v306_v0  ;;  %240 = vmatprep.mubr.msk.f32.mxu0 %vm307_vm0, %v306_v0  ;;  %v28_v1 = vld [vmem:[#allocation2 + $0x8] sm:$0xf]  ;;  %v26_v3 = vld [vmem:[%s336_s0] sm:$0x1]  ;;  %vm31_vm2 = vcmask 97280   ;;  %s308_s1 = smov 112  }
  0x10   :  { %243 = vmatprep.subr.mxu1 %v306_v0  ;;  %247 = vmatprep.mubr.msk.f32.mxu1 %vm307_vm0, %v306_v0  ;;  %v29_v4 = vld [vmem:[#allocation2 + $0x8] sm:$0xff]  ;;  %v30_v5 = vld [vmem:[#allocation2 + $0x10] sm:$0x1]  ;;  %s309_s18 = smov 104   ;;  %vm122_vm3 = vcmask 130048   ;;  %vm201_vm4 = vcmask 57344  }
  0x11   :  { %237 = vmatpush3.msk.msra.mxu0 %vm35_vm1, %v28_v1  ;;  %114 = vrot.lane.b32.xlu0 %v29_v4, %s308_s1  ;;  %s310_s0 = smov 96   ;;  %s311_s19 = smov [#allocation5]   ;;  %vm210_vm5 = vcmask 0  }
  0x12   :  { %238 = vmatprep.subr.mxu0 %v306_v0  ;;  %119 = vrot.lane.b32.xlu1 %v30_v5, %s308_s1  ;;  %s218_s20 = sshll.u32 %s311_s19, 4  ;;  %s219_s20 = int_to_ptr.vmem [resolvable:$true] %s218_s20 }
  0x13   :  { %239 = vmatpush3.msra.mxu0 %v27_v2  ;;  %s279_s21 = scalar_lea.vmem %s219_s20, 16  ;;  %s283_s22 = scalar_lea.vmem %s219_s20, 32 }
  0x14   :  { %241 = vmatmul.mubr.msk.f32.vlgmr.msra.gmra.mxu0 %vm31_vm2, %v26_v3  ;;  %p280_p5 = scmp.ne.s32.totalorder %s219_s20, %s279_s21  ;;  %p284_p6 = scmp.lt.s32.totalorder %s219_s20, %s219_s20 }
  0x15   :  { %112 = vrot.lane.b32.xlu0 %v27_v2, %s308_s1  ;;  %p285_p7 = scmp.lt.s32.totalorder %s283_s22, %s279_s21 }
  0x16   :  { %197 = vrot.lane.b32.xlu1 %v30_v5, %s309_s18 }
  0x17   :  { %p286_p8 = por %p285_p7, %p284_p6 }
  0x19   :  { %p287_p9 = pnand %p286_p8, %p280_p5 }
  0x83   :  { %v115_v6 = vpop.permute.xlu0 %114 }
  0x84   :  { %244 = vmatpush3.msra.mxu1 %v115_v6  ;;  %v120_v12 = vpop.permute.xlu1 %119 }
  0x85   :  { %245 = vmatprep.subr.mxu1 %v306_v0 }
  0x87   :  { %v113_v7 = vpop.permute.xlu0 %112 }
  0x88   :  { %246 = vmatpush3.msra.mxu1 %v113_v7  ;;  %v198_v16 = vpop.permute.xlu1 %197 }
  0xd4   :  { %v105_v8 = vpop.f32.mrf.mxu0 }
  0xd5   :  { %v106_v9 = vadd.f32 %v105_v8, %v30_v5 }
  0xd6   :  { %v242_v10 = vpop.f32.mrf.mxu0 }
  0xd7   :  { %v109_v11 = vmax.f32 %v106_v9, 0.0 }
  0xd9   :  { %248 = vmatmul.mubr.msk.f32.vlgmr.msra.gmra.mxu1 %vm122_vm3, %v109_v11 }
 0x199   :  { %v192_v13 = vpop.f32.mrf.mxu1 }
 0x19a   :  { %v193_v14 = vadd.f32 %v192_v13, %v120_v12 }
 0x19b   :  { %v249_v15 = vpop.f32.mrf.mxu1 }
 0x19c   :  { %v196_v17 = vmax.f32 %v193_v14, 0.0 }
 0x19e   :  { %v200_v18 = vmul.f32 %v198_v16, %v196_v17 }
 0x1a0   :  { %v202_v19 = vsel %vm201_vm4, %v200_v18, 0.0 }
 0x1a1   :  { %203 = vadd.xlane.f32.xlu0 %v202_v19 }
 0x22a   :  { %v204_v20 = vpop.xlane.xlu0 %203 }
 0x22b   :  { %v205_v21 = vadd.f32 %v204_v20, %v30_v5 }
 0x22d   :  { %207 = vrot.lane.b32.xlu1 %v205_v21, %s310_s0 }
 0x29f   :  { %v208_v22 = vpop.permute.xlu1 %207 }
 0x2a0   :  { %211 = vst.msk [vmem:[#allocation5] sm:$0x1] %vm210_vm5, %v208_v22 }
 0x2a1   :  { %290 = shalt.err (!%p287_p9)
}
 0x2a2   :  { %221 = dma.vmem_to_hbm [thread:$0]  %s219_s20, 16, %s338_s2, [#allocation4]  }
 0x2a3   :  { %301 = dma.done.wait [#allocation4], 16  }
 0x2a4   :  { %302 = vsyncadd [#allocation4], 4294967280 }
 0x2a5   :  { %225 = vsyncpa [#allocation3], 1 }
 0x2a6   :  { %226 = vsyncpa [#allocation4], 1 }

</bundles_post_ra>
